<compile_context>
chip_gen: v6e
topology: v6e:2x2x1
jax: 0.10.0
libtpu: 0.0.40
codegen_flags: <defaults>
</compile_context>

<pallas_src>
import functools

import jax
import jax.numpy as jnp
from jax.experimental import pallas as pl
from jax.experimental.pallas import tpu as pltpu


# ----------------------------------------------------------------------------
# Kernel
# ----------------------------------------------------------------------------
def _sae_kernel(x_ref, we_ref, be_ref, wd_ref, bd_ref,   # inputs
                f_ref, out_ref,                          # outputs
                *scratch,
                cast_x, acc_in_out):
    """Grid = (batch_tiles, latent_tiles); the latent axis (j) is the reduction."""
    idx = 0
    if cast_x:
        x_mm_ref = scratch[idx]
        idx += 1
    acc_ref = out_ref if acc_in_out else scratch[idx]

    j = pl.program_id(1)

    # The x tile is VMEM-resident across all j steps; cast it to the MXU input
    # dtype exactly once instead of every latent step.
    if cast_x:
        @pl.when(j == 0)
        def _cast_x():
            x_mm_ref[...] = x_ref[...].astype(x_mm_ref.dtype)
        x = x_mm_ref[...]
    else:
        x = x_ref[...]

    # ---- encoder: f_tile = relu(x @ We[:, j*tm:(j+1)*tm] + be_tile) ---------
    # Weights arrive already in the matmul dtype; f32 MXU accumulation, f32
    # bias+ReLU epilogue on the VPU.
    f32 = jnp.dot(x, we_ref[...], preferred_element_type=jnp.float32)
    f32 = jnp.maximum(f32 + be_ref[...].astype(jnp.float32), 0.0)
    f_ref[...] = f32.astype(f_ref.dtype)

    # ---- decoder: partial sum over the latent axis --------------------------
    partial = jnp.dot(f32.astype(wd_ref.dtype), wd_ref[...],
                      preferred_element_type=jnp.float32)

    @pl.when(j == 0)
    def _init():
        # Fold b_dec into the first partial product: no zero-fill pass over the
        # accumulator and no bias add on the last-step critical path.
        acc_ref[...] = (partial + bd_ref[...].astype(jnp.float32)).astype(acc_ref.dtype)

    @pl.when(j > 0)
    def _accumulate():
        acc_ref[...] = (acc_ref[...].astype(jnp.float32) + partial).astype(acc_ref.dtype)

    if not acc_in_out:
        @pl.when(j == pl.num_programs(1) - 1)
        def _finalize():
            out_ref[...] = acc_ref[...].astype(out_ref.dtype)


# ----------------------------------------------------------------------------
# Parameter prep (one-time, at load; NOT in the per-step hot path)
# ----------------------------------------------------------------------------
def params_from_torch_layout(w_enc, b_enc, w_dec, b_dec, *, matmul_dtype=None):
    """Convert PyTorch nn.Linear layout ([out, in]) to the [in, out] layout the
    kernel consumes, optionally pre-casting the weights to the MXU input dtype
    (bf16 recommended) so no per-call weight casts / f32 weight DMA happen."""
    we = w_enc.T
    wd = w_dec.T
    if matmul_dtype is not None:
        we = we.astype(matmul_dtype)
        wd = wd.astype(matmul_dtype)
    return we, b_enc, wd, b_dec


# ----------------------------------------------------------------------------
# Tiling / VMEM budgeting helpers
# ----------------------------------------------------------------------------
def _largest_tile(total, unit, cap):
    """Largest multiple of `unit` that divides `total`, capped at `cap`."""
    best = None
    t = unit
    while t <= min(total, cap):
        if total % t == 0:
            best = t
        t += unit
    if best is None:
        raise ValueError(f"{total} has no tile that is a multiple of {unit}")
    return best


def _vmem_capacity_bytes():
    """Per-generation VMEM capacity (v5e/v6e: 128 MiB, v7x: 64 MiB)."""
    try:
        info = pltpu.get_tpu_info()
    except Exception:
        return 64 << 20                                   # safe floor (v7x)
    for name in ("vmem_capacity_bytes", "vmem_size_bytes", "vmem_bytes"):
        v = getattr(info, name, None)
        try:
            v = int(v)
        except (TypeError, ValueError):
            continue
        if v > 0:
            return v
    return 64 << 20


def _vmem_estimate(tb, tm, n, *, x_b, w_b, f_b, out_b, bias_b, mm_b,
                   cast_x, acc_in_out):
    est = 2 * tb * n * x_b            # x tile (double-buffered input)
    est += 2 * n * tm * w_b           # W_enc tile
    est += 2 * tm * n * w_b           # W_dec tile
    est += 2 * 8 * tm * bias_b        # b_enc tile (padded to 8 sublanes)
    est += 2 * 8 * n * bias_b         # b_dec tile
    est += 2 * tb * tm * f_b          # f output tile
    est += 2 * tb * n * out_b         # out output tile (resident over j)
    if cast_x:
        est += tb * n * mm_b          # matmul-dtype copy of the resident x tile
    if not acc_in_out:
        est += tb * n * 4             # separate f32 decoder accumulator
    return est


# ----------------------------------------------------------------------------
# Wrapper
# ----------------------------------------------------------------------------
def sae_forward(x, w_enc_io, b_enc, w_dec_io, b_dec, *,
                tb=None, tm=None, out_dtype=None):
    """x: [B, n].  w_enc_io: [n, m], w_dec_io: [m, n] (already [in, out] and in
    the desired MXU dtype — see params_from_torch_layout).  b_enc: [m], b_dec: [n].
    Returns (f [B, m], out [B, n]) in `out_dtype` (defaults to x.dtype)."""
    B, n = x.shape
    n_w, m = w_enc_io.shape
    assert n_w == n, "w_enc_io must be [n, m] (use params_from_torch_layout)"
    assert w_dec_io.shape == (m, n)
    assert b_enc.shape == (m,) and b_dec.shape == (n,)

    matmul_dtype = jnp.dtype(w_enc_io.dtype)          # weights define the MXU dtype
    assert jnp.dtype(w_dec_io.dtype) == matmul_dtype
    out_dtype = jnp.dtype(x.dtype if out_dtype is None else out_dtype)

    cast_x = jnp.dtype(x.dtype) != matmul_dtype
    acc_in_out = out_dtype == jnp.dtype(jnp.float32)  # accumulate directly in out

    x_b = jnp.dtype(x.dtype).itemsize
    w_b = matmul_dtype.itemsize
    o_b = out_dtype.itemsize
    b_b = jnp.dtype(b_enc.dtype).itemsize

    # Sublane packing unit for the batch dimension.
    sub = 8 if min(x_b, o_b) == 4 else 16

    # Per-generation VMEM budget with headroom for semaphores / internal scratch.
    capacity = _vmem_capacity_bytes()
    budget = capacity - max(capacity // 8, 8 << 20)

    # Latent tile: lane-aligned, modest — the weights are streamed once per batch
    # tile, so spend VMEM on tb (arithmetic intensity ~ 2*tb FLOP / weight byte).
    if tm is None:
        tm = _largest_tile(m, 128, 512)
    assert m % tm == 0 and tm % 128 == 0, "tm must divide m and be lane-aligned"

    # Batch tile: biggest divisor of B (multiple of `sub`, <= 1024) whose working
    # set fits the budget, preferring >= 2 batch tiles so both TensorCores are
    # used on v7x (axis 0 is "parallel").
    def _est(t):
        return _vmem_estimate(t, tm, n, x_b=x_b, w_b=w_b, f_b=o_b, out_b=o_b,
                              bias_b=b_b, mm_b=w_b, cast_x=cast_x,
                              acc_in_out=acc_in_out)

    if tb is None:
        cands = [t for t in range(sub, min(B, 1024) + 1, sub) if B % t == 0]
        if not cands:
            raise ValueError(f"batch {B} must be a multiple of {sub}")
        multi = [t for t in cands if B // t >= 2]
        pool = multi if multi else cands
        fits = [t for t in pool if _est(t) <= budget]
        tb = max(fits) if fits else min(pool)
    assert B % tb == 0 and tb % sub == 0, "tb must divide B and be sublane-aligned"

    vmem_est = _est(tb)
    vmem_limit = int(min(capacity - (2 << 20),
                         max(vmem_est + (8 << 20), 32 << 20)))

    be = b_enc.reshape(1, m)
    bd = b_dec.reshape(1, n)
    grid = (B // tb, m // tm)

    scratch_shapes = []
    if cast_x:
        scratch_shapes.append(pltpu.VMEM((tb, n), matmul_dtype))
    if not acc_in_out:
        scratch_shapes.append(pltpu.VMEM((tb, n), jnp.float32))

    # Advisory cost estimate for the XLA scheduler.
    cost = pl.CostEstimate(
        flops=4 * B * n * m,                              # enc + dec matmuls
        transcendentals=0,
        bytes_accessed=int(B * n * x_b                    # x read
                           + B * m * o_b                  # f written
                           + B * n * o_b                  # out written
                           + (B // tb) * 2 * n * m * w_b  # weights streamed
                           ),
    )

    kernel = functools.partial(_sae_kernel, cast_x=cast_x, acc_in_out=acc_in_out)

    return pl.pallas_call(
        kernel,
        out_shape=(
            jax.ShapeDtypeStruct((B, m), out_dtype),      # f
            jax.ShapeDtypeStruct((B, n), out_dtype),      # out
        ),
        grid_spec=pltpu.PrefetchScalarGridSpec(
            num_scalar_prefetch=0,
            grid=grid,
            in_specs=[
                pl.BlockSpec((tb, n), lambda i, j: (i, 0)),   # x  (resident over j)
                pl.BlockSpec((n, tm), lambda i, j: (0, j)),   # W_enc tile
                pl.BlockSpec((1, tm), lambda i, j: (0, j)),   # b_enc tile
                pl.BlockSpec((tm, n), lambda i, j: (j, 0)),   # W_dec tile
                pl.BlockSpec((1, n), lambda i, j: (0, 0)),    # b_dec (resident)
            ],
            out_specs=[
                pl.BlockSpec((tb, tm), lambda i, j: (i, j)),  # f tile
                pl.BlockSpec((tb, n), lambda i, j: (i, 0)),   # out (accumulated)
            ],
            scratch_shapes=scratch_shapes,
        ),
        compiler_params=pltpu.CompilerParams(
            dimension_semantics=("parallel", "arbitrary"),
            vmem_limit_bytes=vmem_limit),
        cost_estimate=cost,
    )(x, w_enc_io, be, w_dec_io, bd)


# ----------------------------------------------------------------------------
# Demo / correctness check
# ----------------------------------------------------------------------------
if __name__ == "__main__":
    # Small but MXU/tiling-friendly shapes: batch=128, n=128 (input), m=512 (latent).
    B, n, m = 128, 128, 512
    key = jax.random.PRNGKey(0)
    kx, ke, kd = jax.random.split(key, 3)

    x = jax.random.normal(kx, (B, n), dtype=jnp.float32)

    # Parameters in PyTorch nn.Linear layout ([out, in]); biases zero per module.
    bound_e = 1.0 / jnp.sqrt(jnp.float32(n))
    bound_d = 1.0 / jnp.sqrt(jnp.float32(m))
    w_enc = jax.random.uniform(ke, (m, n), jnp.float32, -bound_e, bound_e)
    b_enc = jnp.zeros((m,), jnp.float32)
    w_dec = jax.random.uniform(kd, (n, m), jnp.float32, -bound_d, bound_d)
    b_dec = jnp.zeros((n,), jnp.float32)

    # Pure-JAX reference.
    f_ref = jnp.maximum(x @ w_enc.T + b_enc, 0.0)
    out_ref = f_ref @ w_dec.T + b_dec

    # ---- exact path: f32 weights, f32 outputs (accumulates directly in out) --
    we32, be32, wd32, bd32 = params_from_torch_layout(w_enc, b_enc, w_dec, b_dec)
    sae_f32 = jax.jit(functools.partial(sae_forward, tb=64, tm=128))
    f, out = sae_f32(x, we32, be32, wd32, bd32)
    jax.block_until_ready((f, out))
    assert f.shape == (B, m) and out.shape == (B, n)
    assert jnp.allclose(f, f_ref, atol=1e-4, rtol=1e-4)
    assert jnp.allclose(out, out_ref, atol=1e-4, rtol=1e-4)

    # ---- fast path: bf16 weights pre-cast in HBM (one-time, load-time), bf16
    #      MXU inputs with f32 accumulation, bf16 outputs, auto tb selection ----
    we16, be16, wd16, bd16 = params_from_torch_layout(
        w_enc, b_enc, w_dec, b_dec, matmul_dtype=jnp.bfloat16)
    we16, wd16 = jax.block_until_ready((we16, wd16))
    sae_bf16 = jax.jit(functools.partial(sae_forward, tm=256,
                                         out_dtype=jnp.bfloat16))
    f16, out16 = sae_bf16(x, we16, be16, wd16, bd16)
    jax.block_until_ready((f16, out16))
    assert jnp.allclose(f16.astype(jnp.float32), f_ref, atol=1e-1, rtol=1e-1)
    assert jnp.allclose(out16.astype(jnp.float32), out_ref, atol=1e-1, rtol=1e-1)

    print("KERNEL_OK")
</pallas_src>

<mosaic_0001>
module attributes {stable_mosaic.version = 11 : i64} {
  func.func @_sae_kernel(%arg0: i32, %arg1: i32, %arg2: memref<64x128xf32, #tpu.memory_space<vmem>>, %arg3: memref<128x128xf32, #tpu.memory_space<vmem>>, %arg4: memref<1x128xf32, #tpu.memory_space<vmem>>, %arg5: memref<128x128xf32, #tpu.memory_space<vmem>>, %arg6: memref<1x128xf32, #tpu.memory_space<vmem>>, %arg7: memref<64x128xf32, #tpu.memory_space<vmem>>, %arg8: memref<64x128xf32, #tpu.memory_space<vmem>>) attributes {dimension_semantics = [#tpu.dimension_semantics<parallel>, #tpu.dimension_semantics<arbitrary>], iteration_bounds = array<i64: 2, 4>, scalar_prefetch = 0 : i64, scratch_operands = 0 : i64, tpu.core_type = #tpu.core_type<tc>, window_params = [{transform_indices = @transform_0, window_bounds = array<i64: 64, 128>}, {transform_indices = @transform_1, window_bounds = array<i64: 128, 128>}, {transform_indices = @transform_2, window_bounds = array<i64: 1, 128>}, {transform_indices = @transform_3, window_bounds = array<i64: 128, 128>}, {pipeline_mode = #tpu.pipeline_mode<synchronous>, transform_indices = @transform_4, window_bounds = array<i64: 1, 128>}, {transform_indices = @transform_5, window_bounds = array<i64: 64, 128>}, {transform_indices = @transform_6, window_bounds = array<i64: 64, 128>}]} {
    %c0 = arith.constant 0 : index
    %c0_0 = arith.constant 0 : index
    %0 = vector.load %arg2[%c0, %c0_0] : memref<64x128xf32, #tpu.memory_space<vmem>>, vector<64x128xf32>
    %c0_1 = arith.constant 0 : index
    %c0_2 = arith.constant 0 : index
    %1 = vector.load %arg3[%c0_1, %c0_2] : memref<128x128xf32, #tpu.memory_space<vmem>>, vector<128x128xf32>
    %cst = arith.constant dense<0.000000e+00> : vector<64x128xf32>
    %2 = tpu.matmul %0, %1, %cst {dimension_numbers = #tpu.dot_dimension_numbers<[1], [0], [0], [1], [0, 0, 1, 1], [], []>} : vector<64x128xf32>, vector<128x128xf32>, vector<64x128xf32> -> vector<64x128xf32>
    %c0_3 = arith.constant 0 : index
    %c0_4 = arith.constant 0 : index
    %3 = vector.load %arg4[%c0_3, %c0_4] : memref<1x128xf32, #tpu.memory_space<vmem>>, vector<1x128xf32>
    %4 = vector.broadcast %3 : vector<1x128xf32> to vector<64x128xf32>
    %5 = arith.addf %2, %4 : vector<64x128xf32>
    %cst_5 = arith.constant 0.000000e+00 : f32
    %6 = vector.broadcast %cst_5 : f32 to vector<64x128xf32>
    %7 = arith.maximumf %5, %6 : vector<64x128xf32>
    %c0_6 = arith.constant 0 : index
    %c0_7 = arith.constant 0 : index
    %8 = vector.load %arg7[%c0_6, %c0_7] : memref<64x128xf32, #tpu.memory_space<vmem>>, vector<64x128xf32>
    tpu.vector_store %arg7[%c0_6, %c0_7], %7 {strides = array<i32>} : memref<64x128xf32, #tpu.memory_space<vmem>>, vector<64x128xf32>,
    %c0_8 = arith.constant 0 : index
    %c0_9 = arith.constant 0 : index
    %9 = vector.load %arg5[%c0_8, %c0_9] : memref<128x128xf32, #tpu.memory_space<vmem>>, vector<128x128xf32>
    %cst_10 = arith.constant dense<0.000000e+00> : vector<64x128xf32>
    %10 = tpu.matmul %7, %9, %cst_10 {dimension_numbers = #tpu.dot_dimension_numbers<[1], [0], [0], [1], [0, 0, 1, 1], [], []>} : vector<64x128xf32>, vector<128x128xf32>, vector<64x128xf32> -> vector<64x128xf32>
    %c0_i32 = arith.constant 0 : i32
    %11 = arith.cmpi eq, %arg1, %c0_i32 : i32
    %12 = arith.extui %11 : i1 to i32
    %c0_i32_11 = arith.constant 0 : i32
    %13 = arith.cmpi ne, %12, %c0_i32_11 : i32
    scf.if %13 {
      %c0_14 = arith.constant 0 : index
      %c0_15 = arith.constant 0 : index
      %17 = vector.load %arg6[%c0_14, %c0_15] : memref<1x128xf32, #tpu.memory_space<vmem>>, vector<1x128xf32>
      %18 = vector.broadcast %17 : vector<1x128xf32> to vector<64x128xf32>
      %19 = arith.addf %10, %18 : vector<64x128xf32>
      %c0_16 = arith.constant 0 : index
      %c0_17 = arith.constant 0 : index
      %20 = vector.load %arg8[%c0_16, %c0_17] : memref<64x128xf32, #tpu.memory_space<vmem>>, vector<64x128xf32>
      tpu.vector_store %arg8[%c0_16, %c0_17], %19 {strides = array<i32>} : memref<64x128xf32, #tpu.memory_space<vmem>>, vector<64x128xf32>,
    } else {
    }
    %c0_i32_12 = arith.constant 0 : i32
    %14 = arith.cmpi sgt, %arg1, %c0_i32_12 : i32
    %15 = arith.extui %14 : i1 to i32
    %c0_i32_13 = arith.constant 0 : i32
    %16 = arith.cmpi ne, %15, %c0_i32_13 : i32
    scf.if %16 {
      %c0_14 = arith.constant 0 : index
      %c0_15 = arith.constant 0 : index
      %17 = vector.load %arg8[%c0_14, %c0_15] : memref<64x128xf32, #tpu.memory_space<vmem>>, vector<64x128xf32>
      %18 = arith.addf %17, %10 : vector<64x128xf32>
      %c0_16 = arith.constant 0 : index
      %c0_17 = arith.constant 0 : index
      %19 = vector.load %arg8[%c0_16, %c0_17] : memref<64x128xf32, #tpu.memory_space<vmem>>, vector<64x128xf32>
      tpu.vector_store %arg8[%c0_16, %c0_17], %18 {strides = array<i32>} : memref<64x128xf32, #tpu.memory_space<vmem>>, vector<64x128xf32>,
    } else {
    }
    return
  }
  func.func @transform_0(%arg0: i32, %arg1: i32) -> (i32, i32) {
    %c0_i32 = arith.constant 0 : i32
    %c0_i32_0 = arith.constant 0 : i32
    return %arg0, %c0_i32 : i32, i32
  }
  func.func @transform_1(%arg0: i32, %arg1: i32) -> (i32, i32) {
    %c0_i32 = arith.constant 0 : i32
    %c0_i32_0 = arith.constant 0 : i32
    return %c0_i32, %arg1 : i32, i32
  }
  func.func @transform_2(%arg0: i32, %arg1: i32) -> (i32, i32) {
    %c0_i32 = arith.constant 0 : i32
    %c0_i32_0 = arith.constant 0 : i32
    return %c0_i32, %arg1 : i32, i32
  }
  func.func @transform_3(%arg0: i32, %arg1: i32) -> (i32, i32) {
    %c0_i32 = arith.constant 0 : i32
    %c0_i32_0 = arith.constant 0 : i32
    return %arg1, %c0_i32 : i32, i32
  }
  func.func @transform_4(%arg0: i32, %arg1: i32) -> (i32, i32) {
    %c0_i32 = arith.constant 0 : i32
    %c0_i32_0 = arith.constant 0 : i32
    %c0_i32_1 = arith.constant 0 : i32
    return %c0_i32, %c0_i32_0 : i32, i32
  }
  func.func @transform_5(%arg0: i32, %arg1: i32) -> (i32, i32) {
    %c0_i32 = arith.constant 0 : i32
    return %arg0, %arg1 : i32, i32
  }
  func.func @transform_6(%arg0: i32, %arg1: i32) -> (i32, i32) {
    %c0_i32 = arith.constant 0 : i32
    %c0_i32_0 = arith.constant 0 : i32
    return %arg0, %c0_i32 : i32, i32
  }
}

</mosaic_0001>

<bundles_post_ra>
// kernel: sae_forward.1
= control target key start
LH: loop header
LB: loop body
LE: loop exit
PB: predicated region body
PF: predicated region fallthrough
CT: control target
= control target key end

     0   :  { %s2036_s0 = inlined_call_operand.hbm [shape: f32[128,128], index: 0, kind: input, shape index: {}]   ;;  %s2037_s1 = inlined_call_operand.hbm [shape: f32[128,512], index: 1, kind: input, shape index: {}]   ;;  %s2038_s2 = inlined_call_operand.vmem [shape: f32[1,512], index: 2, kind: input, shape index: {}]   ;;  %s2039_s3 = inlined_call_operand.hbm [shape: f32[512,128], index: 3, kind: input, shape index: {}]   ;;  %s2040_s4 = inlined_call_operand.vmem [shape: f32[1,128], index: 4, kind: input, shape index: {}]   ;;  %s2041_s5 = inlined_call_operand.hbm [shape: f32[128,512], index: 5, kind: output, shape index: {0}]   ;;  %s2042_s6 = inlined_call_operand.hbm [shape: f32[128,128], index: 6, kind: output, shape index: {1}]  }
   0x1   :  { %2066 = sst [smem:[#allocation29_spill]] %s2036_s0 }
   0x2   :  { %2067 = sst [smem:[#allocation30_spill]] %s2037_s1 }
   0x3   :  { %2068 = sst [smem:[#allocation31_spill]] %s2038_s2 }
   0x4   :  { %2069 = sst [smem:[#allocation32_spill]] %s2040_s4 }
   0x5   :  { %2070 = sst [smem:[#allocation33_spill]] %s2041_s5 }
   0x6   :  { %2071 = sst [smem:[#allocation34_spill]] %s2042_s6 }
   0x7   :  { %12 = vsyncpa [#allocation3], 0 }
   0x8   :  { %14 = vsyncpa [#allocation3 + $0x1], 0 }
   0x9   :  { %15 = vsyncpa [#allocation6], 0 }
   0xa   :  { %17 = vsyncpa [#allocation6 + $0x1], 0 }
   0xb   :  { %18 = vsyncpa [#allocation4], 0 }
   0xc   :  { %20 = vsyncpa [#allocation4 + $0x1], 0 }
   0xd   :  { %21 = vsyncpa [#allocation10], 0 }
   0xe   :  { %23 = vsyncpa [#allocation10 + $0x1], 0  ;;  %s1552_s21 = smov 0   ;;  %s1554_s22 = smov 0  }
   0xf   :  { %s1556_s23 = smov 0   ;;  %s1558_s24 = smov 0  }
  0x10   :  { %s1560_s25 = smov 0   ;;  %s1562_s26 = smov 0  }
  0x11   :  { %s1564_s27 = smov 0   ;;  %s1566_s28 = smov 0  }
  0x12   :  { %s1568_s29 = smov 0   ;;  %s1570_s30 = smov 0  }
  0x13   :  { %s1572_s7 = smov 0   ;;  %s1574_s8 = smov 0  }
  0x14   :  { %s1576_s9 = smov 0   ;;  %s1578_s10 = smov 0  }
  0x15 LB: > { %2072 = sst [smem:[#allocation15_spill]] %s1460_s23  ;;  %s2043_s11 = sadd.s32 1, %s1496_s8  ;;  %s1504_s10 = sphi %s1578_s10, %s29_s10   ;;  %s1500_s9 = sphi %s1576_s9, %s2136_s9   ;;  %s1496_s8 = sphi %s1574_s8, %s2128_s8   ;;  %s1492_s7 = sphi %s1572_s7, %s2127_s7   ;;  %s1488_s30 = sphi %s1570_s30, %s2126_s30   ;;  %s1484_s29 = sphi %s1568_s29, %s2125_s29   ;;  %s1480_s28 = sphi %s1566_s28, %s2135_s28   ;;  %s1476_s27 = sphi %s1564_s27, %s2134_s27   ;;  %s1472_s26 = sphi %s1562_s26, %s2123_s26   ;;  %s1468_s25 = sphi %s1560_s25, %s2133_s25   ;;  %s1464_s24 = sphi %s1558_s24, %s2132_s24   ;;  %s1460_s23 = sphi %s1556_s23, %s2121_s23   ;;  %s1456_s22 = sphi %s1554_s22, %s2131_s22   ;;  %s1452_s21 = sphi %s1552_s21, %s2130_s21  }
  0x16   : > { %2073 = sst [smem:[#allocation16_spill]] %s1472_s26  ;;  %p56_p0 = scmp.eq.s32.totalorder %s1504_s10, 0 }
  0x17   : > { %2074 = sst [smem:[#allocation17_spill]] %s1484_s29  ;;  %p1626_p1 = scmp.ge.s32.totalorder %s2043_s11, 4 }
  0x18   : > { %2075 = sst [smem:[#allocation18_spill]] %s1488_s30  ;;  %p81_p2 = scmp.ne.s32.totalorder %s1472_s26, %s1468_s25 }
  0x19   : > { %2076 = sst [smem:[#allocation19_spill]] %s1492_s7  ;;  %p87_p3 = scmp.ne.s32.totalorder %s1468_s25, %s1464_s24 }
  0x1a   : > { %2077 = sst [smem:[#allocation20_spill]] %s1496_s8  ;;  %p2056_p4 = scmp.lt.s32.totalorder %s1504_s10, 8 }
  0x1b   : > { %2078 = sst [smem:[#allocation21_spill]] %s1500_s9  ;;  %p83_p5 = por %p81_p2, %p56_p0 }
  0x1c   : > { %s262_s14 = sand.u32 1, %s1504_s10   ;;  %s264_s15 = sand.u32 1, %s1472_s26  }
  0x1d   : > { %s1640_s16 = sshll.u32 %s264_s15, 7  ;;  %s932_s17 = sshll.u32 %s1496_s8, 7 }
  0x1e   : > { %s2080_s1 = sld [smem:[#allocation30_spill]]  ;;  %s266_s11 = scalar_lea.vmem [#allocation5], %s1640_s16 }
  0x1f   : > { %s272_s6 = sshll.u32 %s266_s11, 4  ;;  %p1649_p6 = pnand %p2056_p4, %p83_p5  ;;  %s273_s6 = int_to_ptr.vmem [resolvable:$true] %s272_s6 }
  0x20   : > { %p936_p7 = scmp.ge.s32.totalorder %s1504_s10, 1  ;;  %s1654_s5 = scalar_lea.sflag [#allocation6], %s262_s14 }
  0x21   : > { %p2055_p8 = pneg %p1649_p6  ;;  %s1255_s15 = scalar_lea.vmem %s273_s6, 2048 }
  0x22   : > { %p1256_p9 = scmp.ne.s32.totalorder %s273_s6, %s1255_s15  ;;  %s1506_s11 = smov [#allocation5]  }
  0x24   : > { %s271_s20 = scalar_lea.hbm %s2080_s1, %s932_s17  ;;  %p1258_p10 = pnand %p1256_p9, %p2055_p8 }
  0x25   : > { %s1260_s17 = sshll.u32 %s1506_s11, 4  ;;  %s1261_s17 = int_to_ptr.vmem [resolvable:$false] %s1260_s17 }
  0x26   : > { %p1259_p11 = pneg %p1258_p10  ;;  %s1262_s18 = scalar_lea.vmem %s1261_s17, 4096 }
  0x27   : > { %p1263_p12 = scmp.lt.s32.totalorder %s273_s6, %s1261_s17  ;;  %p1264_p13 = scmp.lt.s32.totalorder %s1262_s18, %s1255_s15 }
  0x29   : > { %p1265_p2 = por %p1264_p13, %p1263_p12 }
  0x2b   : > { %p1266_p5 = pnand %p1265_p2, %p1259_p11 }
  0x2d   : > { %1269 = shalt.err (!%p1266_p5)
}
  0x2e   : > { %s1507_s19 = smov 512   ;;  %s2046_s14 = smov 128  }
  0x2f   : > { %s2048_s15 = smov 8   ;;  %p307_p9 = scmp.lt.s32.totalorder %s1504_s10, 9 }
  0x30   : > { %1111 = dma.hbm_to_vmem [thread:$0]  (!%p1649_p6), %s271_s20, 2048, %s273_s6, %s1654_s5, %s1507_s19, %s2046_s14, %s2048_s15  }
  0x31   : > { %p1669_p10 = pnand %p936_p7, %p307_p9  ;;  %s1674_s17 = sadd.s32 4294967295, %s1504_s10  }
  0x32   : > { %s925_s18 = sadd.s32 4294967294, %s1504_s10   ;;  %s2083_s1 = sadd.s32 1, %s1496_s8 }
  0x33   : > { %s2138_s1 = smov (%p1626_p1, %s2083_s1), 0  ;;  %s41_s6 = sadd.s32 1, %s1500_s9 }
  0x34   : > { %2084 = sst [smem:[#allocation22_spill]] %s2138_s1  ;;  %s48_s20 = sadd.s32 1, %s1484_s29 }
  0x35   : > { %s2140_s6 = smov (!%p1626_p1, %s41_s6), %s1500_s9  ;;  %p55_p7 = scmp.ne.s32.totalorder %s1484_s29, %s1480_s28 }
  0x36   : > { %p2058_p11 = scmp.ne.s32.totalorder %s1480_s28, %s1476_s27  ;;  %p43_p12 = scmp.ge.s32.totalorder %s2140_s6, 2 }
  0x37   : > { %p62_p13 = scmp.eq.s32.totalorder %s1674_s17, 0  ;;  %p1698_p2 = por %p56_p0, %p55_p7 }
  0x38   : > { %s71_s14 = ssub.s32 %s1496_s8, %s2138_s1  ;;  %s2142_s6 = smov (%p43_p12, %s2140_s6), 0 }
  0x39   : > { %2086 = sst [smem:[#allocation23_spill]] %s2142_s6  ;;  %p1709_p1 = por %p62_p13, %p2058_p11 }
  0x3a   : > { %p72_p5 = scmp.eq.s32.totalorder %s71_s14, 0  ;;  %s45_s15 = ssub.s32 %s1500_s9, %s2142_s6 }
  0x3b   : > { %s2087_s12 = scalar_select %p1709_p1, 1, 0 }
  0x3c   : > { %p1718_p0 = por %p87_p3, %p62_p13  ;;  %p46_p9 = scmp.eq.s32.totalorder %s45_s15, 0 }
  0x3d   : > { %2088 = sst [smem:[#allocation24_spill]] %s2087_s12  ;;  %s172_s1 = sor.u32 %s71_s14, %s45_s15 }
  0x3e   : > { %s2089_s7 = scalar_select %p1718_p0, 1, 0 }
  0x3f   : > { %s2090_s4 = sadd.s32 1, %s1472_s26  ;;  %p173_p12 = scmp.eq.s32.totalorder %s172_s1, 0 }
  0x40   : > { %s1725_s2 = scalar_select %p72_p5, %s1472_s26, %s2090_s4  }
  0x41   : > { %s1728_s30 = scalar_select %p46_p9, %s1484_s29, %s48_s20  }
  0x42   : > { %2091 = sst [smem:[#allocation25_spill]] %s1725_s2  ;;  %s175_s12 = sadd.s32 1, %s1460_s23 }
  0x43   : > { %2092 = sst [smem:[#allocation26_spill]] %s1728_s30  ;;  %p185_p8 = scmp.ne.s32.totalorder %s1460_s23, %s1456_s22 }
  0x44   : > { %p186_p4 = scmp.eq.s32.totalorder %s1674_s17, 7  ;;  %p191_p13 = scmp.ne.s32.totalorder %s1456_s22, %s1452_s21 }
  0x45   : > { %s1735_s24 = scalar_select %p173_p12, %s1460_s23, %s175_s12  }
  0x46   : > { %p1737_p3 = por %p186_p4, %p185_p8  ;;  %p192_p11 = scmp.eq.s32.totalorder %s925_s18, 7 }
  0x47   : > { %2093 = sst [smem:[#allocation27_spill]] %s1735_s24  ;;  %p1746_p5 = por %p186_p4, %p55_p7 }
  0x48   : > { %s241_s1 = sand.u32 1, %s1484_s29   ;;  %s955_s14 = sshll.u32 %s1500_s9, 10 }
  0x49   : > { %p1752_p9 = por %p192_p11, %p191_p13  ;;  %p2097_p0 = scmp.ne.s32.totalorder %s1480_s28, %s1476_s27 }
  0x4a   : > { %s928_s12 = sshll.u32 %s241_s1, 6  ;;  %s2100_s0 = sld [smem:[#allocation29_spill]] }
  0x4b   : > { %s2096_s15 = scalar_select %p1752_p9, 1, 0 }
  0x4c   : > { %p1759_p12 = por %p192_p11, %p2097_p0  ;;  %s245_s26 = scalar_lea.vmem [#allocation2], %s928_s12 }
  0x4d   : > { %s252_s24 = sshll.u32 %s245_s26, 4  ;;  %p2101_p4 = scmp.lt.s32.totalorder %s1504_s10, 8  ;;  %s253_s24 = int_to_ptr.vmem [resolvable:$true] %s252_s24 }
  0x4e   : > { %s2098_s20 = scalar_select %p1759_p12, 1, 0 }
  0x4f   : > { %p1770_p8 = pnand %p2101_p4, %p1698_p2  ;;  %s956_s29 = sshll.u32 %s1496_s8, 11 }
  0x50   : > { %2099 = sst [smem:[#allocation28_spill]] %s2098_s20  ;;  %s251_s18 = scalar_lea.hbm %s2100_s0, %s955_s14 }
  0x51   : > { %s242_s23 = scalar_lea.sflag [#allocation3], %s241_s1  ;;  %p1272_p7 = pneg %p1770_p8 }
  0x52   : > { %s1283_s20 = scalar_lea.vmem %s253_s24, 1024  ;;  %s1510_s2 = smov [#allocation2]  }
  0x53   : > { %p1284_p11 = scmp.ne.s32.totalorder %s253_s24, %s1283_s20  ;;  %s1288_s30 = sshll.u32 %s1510_s2, 4  ;;  %s1289_s30 = int_to_ptr.vmem [resolvable:$false] %s1288_s30 }
  0x54   : > { %s1290_s26 = scalar_lea.vmem %s1289_s30, 2048  ;;  %p1291_p12 = scmp.lt.s32.totalorder %s253_s24, %s1289_s30 }
  0x55   : > { %p1286_p0 = pnand %p1284_p11, %p1272_p7  ;;  %p1292_p9 = scmp.lt.s32.totalorder %s1290_s26, %s1283_s20 }
  0x57   : > { %p1287_p13 = pneg %p1286_p0  ;;  %p1293_p2 = por %p1292_p9, %p1291_p12 }
  0x59   : > { %p1294_p4 = pnand %p1293_p2, %p1287_p13 }
  0x5b   : > { %1297 = shalt.err (!%p1294_p4)
}
  0x5c   : > { %s2103_s19 = smov 8   ;;  %s2104_s14 = smov 128  }
  0x5d   : > { %1108 = dma.hbm_to_vmem [thread:$0]  (!%p1770_p8), %s251_s18, 1024, %s253_s24, %s242_s23, %s2104_s14, %s2104_s14, %s2103_s19  }
  0x5e   : > { %s298_s0 = scalar_lea.hbm %s2039_s3, %s956_s29  ;;  %s292_s2 = scalar_lea.vmem [#allocation7], %s1640_s16 }
  0x5f   : > { %s299_s8 = sshll.u32 %s292_s2, 4  ;;  %p2105_p9 = pneg %p1649_p6  ;;  %s300_s8 = int_to_ptr.vmem [resolvable:$true] %s299_s8 }
  0x60   : > { %s1311_s30 = scalar_lea.vmem %s300_s8, 2048  ;;  %s1511_s9 = smov [#allocation7]  }
  0x61   : > { %p1312_p7 = scmp.ne.s32.totalorder %s300_s8, %s1311_s30  ;;  %s1316_s20 = sshll.u32 %s1511_s9, 4  ;;  %s1317_s20 = int_to_ptr.vmem [resolvable:$false] %s1316_s20 }
  0x62   : > { %s1318_s26 = scalar_lea.vmem %s1317_s20, 4096  ;;  %p1319_p0 = scmp.lt.s32.totalorder %s300_s8, %s1317_s20 }
  0x63   : > { %p1314_p12 = pnand %p1312_p7, %p2105_p9  ;;  %p1320_p13 = scmp.lt.s32.totalorder %s1318_s26, %s1311_s30 }
  0x65   : > { %p1315_p11 = pneg %p1314_p12  ;;  %p1321_p8 = por %p1320_p13, %p1319_p0 }
  0x67   : > { %p1322_p2 = pnand %p1321_p8, %p1315_p11 }
  0x69   : > { %1325 = shalt.err (!%p1322_p2)
}
  0x6a   : > { %1114 = dma.hbm_to_vmem [thread:$0]  (!%p1649_p6), %s298_s0, 2048, %s300_s8, %s1654_s5, %s2104_s14, %s2104_s14, %s2103_s19  }
  0x6b   : > { %311 = sbr.rel (%p1669_p10) target bundleno = 636 (0x27c), region = 40  ;;  %s1798_s29 = sand.u32 (!%p1669_p10), 1, %s1480_s28  }
  0x6c   : > { %s937_s16 = sshll.u32 (!%p1669_p10), %s1798_s29, 6  ;;  %s314_s24 = scalar_lea.sflag (!%p1669_p10), [#allocation3], %s1798_s29 }
  0x6d   : > { %s1804_s18 = scalar_lea.vmem (!%p1669_p10), [#allocation2], %s937_s16 }
  0x70   : > { %1435 = dma.done.wait (%p1709_p1), %s314_s24, 1024  }
  0x71   : > { %1437 = vsyncadd (%p1709_p1), %s314_s24, 4294966272  ;;  %s322_s0 = sand.u32 1, %s1674_s17   ;;  %s324_s5 = sand.u32 1, %s1468_s25  }
  0x72   : > { %s938_s8 = sshll.u32 %s324_s5, 7  ;;  %s323_s13 = scalar_lea.sflag [#allocation6], %s322_s0 }
  0x73   : > { %s1812_s11 = scalar_lea.vmem [#allocation5], %s938_s8  ;;  %p2107_p6 = scmp.ne.s32.totalorder %s2089_s7, 0 }
  0x75   : > { %1439 = dma.done.wait (%p2107_p6), %s323_s13, 4096  }
  0x76   : > { %1441 = vsyncadd (%p2107_p6), %s323_s13, 4294963200  ;;  %v412_v0 = vld [vmem:[%s1812_s11 + $0x78] sm:$0xff]  ;;  %v411_v1 = vld [vmem:[%s1812_s11 + $0x70] sm:$0xff]  ;;  %s1825_s7 = scalar_lea.vmem [#allocation7], %s938_s8  ;;  %s2108_s17 = sld [smem:[#allocation18_spill]] }
  0x77   : > { %1007 = vmatprep.subr.mxu0 %v412_v0  ;;  %v410_v2 = vld [vmem:[%s1812_s11 + $0x68] sm:$0xff]  ;;  %v409_v3 = vld [vmem:[%s1812_s11 + $0x60] sm:$0xff]  ;;  %v408_v5 = vld [vmem:[%s1812_s11 + $0x58] sm:$0xff]  ;;  %s2109_s12 = sld [smem:[#allocation31_spill]]  ;;  %s372_s30 = sand.u32 1, %s1456_s22  }
  0x78   : > { %1008 = vmatpush3.msra.mxu0 %v412_v0  ;;  %v389_v4 = vld [vmem:[%s1804_s18] sm:$0xff]  ;;  %v407_v6 = vld [vmem:[%s1812_s11 + $0x50] sm:$0xff]  ;;  %v556_v7 = vld [vmem:[%s1825_s7 + $0x78] sm:$0xff]  ;;  %s940_s9 = sshll.u32 %s372_s30, 6  ;;  %s1880_s26 = scalar_lea.vmem [#allocation9], %s937_s16 }
  0x79   : > { %1009 = vmatprep.subr.mxu0 %v411_v1  ;;  %1039 = vmatprep.mubr.f32.mxu0 %v389_v4  ;;  %v555_v8 = vld [vmem:[%s1825_s7 + $0x70] sm:$0xff]  ;;  %v406_v9 = vld [vmem:[%s1812_s11 + $0x48] sm:$0xff]  ;;  %v405_v11 = vld [vmem:[%s1812_s11 + $0x40] sm:$0xff]  ;;  %s1868_s20 = scalar_lea.vmem [#allocation8], %s940_s9 }
  0x7a   : > { %1010 = vmatpush3.msra.mxu0 %v411_v1  ;;  %1051 = vmatprep.subr.mxu1 %v556_v7  ;;  %v554_v10 = vld [vmem:[%s1825_s7 + $0x68] sm:$0xff]  ;;  %v553_v12 = vld [vmem:[%s1825_s7 + $0x60] sm:$0xff]  ;;  %v404_v13 = vld [vmem:[%s1812_s11 + $0x38] sm:$0xff] }
  0x7b   : > { %1011 = vmatprep.subr.mxu0 %v410_v2  ;;  %1052 = vmatpush3.msra.mxu1 %v556_v7  ;;  %v552_v14 = vld [vmem:[%s1825_s7 + $0x58] sm:$0xff]  ;;  %v403_v15 = vld [vmem:[%s1812_s11 + $0x30] sm:$0xff]  ;;  %v402_v17 = vld [vmem:[%s1812_s11 + $0x28] sm:$0xff] }
  0x7c   : > { %1012 = vmatpush3.msra.mxu0 %v410_v2  ;;  %1053 = vmatprep.subr.mxu1 %v555_v8  ;;  %v551_v16 = vld [vmem:[%s1825_s7 + $0x50] sm:$0xff]  ;;  %v550_v18 = vld [vmem:[%s1825_s7 + $0x48] sm:$0xff]  ;;  %v401_v19 = vld [vmem:[%s1812_s11 + $0x20] sm:$0xff]  ;;  %p383_p10 = scmp.lt.s32.totalorder %s2108_s17, 3  ;;  %p943_p1 = scmp.ne.s32.totalorder %s2108_s17, 0 }
  0x7d   : > { %1013 = vmatprep.subr.mxu0 %v409_v3  ;;  %1054 = vmatpush3.msra.mxu1 %v555_v8  ;;  %v549_v20 = vld [vmem:[%s1825_s7 + $0x40] sm:$0xff]  ;;  %v400_v21 = vld [vmem:[%s1812_s11 + $0x18] sm:$0xff]  ;;  %v399_v23 = vld [vmem:[%s1812_s11 + $0x10] sm:$0xff] }
  0x7e   : > { %1014 = vmatpush3.msra.mxu0 %v409_v3  ;;  %1055 = vmatprep.subr.mxu1 %v554_v10  ;;  %v548_v22 = vld [vmem:[%s1825_s7 + $0x38] sm:$0xff]  ;;  %v547_v24 = vld [vmem:[%s1825_s7 + $0x30] sm:$0xff]  ;;  %v398_v25 = vld [vmem:[%s1812_s11 + $0x8] sm:$0xff]  ;;  %s384_s19 = scalar_select %p383_p10, %s2108_s17, 3 }
  0x7f   : > { %1015 = vmatprep.subr.mxu0 %v408_v5  ;;  %1056 = vmatpush3.msra.mxu1 %v554_v10  ;;  %v546_v26 = vld [vmem:[%s1825_s7 + $0x28] sm:$0xff]  ;;  %v397_v27 = vld [vmem:[%s1812_s11] sm:$0xff]  ;;  %v391_v30 = vld [vmem:[%s1804_s18 + $0x10] sm:$0xff] }
  0x80   : > { %1016 = vmatpush3.msra.mxu0 %v408_v5  ;;  %1057 = vmatprep.subr.mxu1 %v553_v12  ;;  %v545_v28 = vld [vmem:[%s1825_s7 + $0x20] sm:$0xff]  ;;  %v390_v29 = vld [vmem:[%s1804_s18 + $0x8] sm:$0xff]  ;;  %v392_v31 = vld [vmem:[%s1804_s18 + $0x18] sm:$0xff]  ;;  %s385_s2 = scalar_lea.vmem %s2109_s12, %s384_s19 }
  0x81   : > { %1017 = vmatprep.subr.mxu0 %v407_v6  ;;  %1058 = vmatpush3.msra.mxu1 %v553_v12  ;;  %v393_v32 = vld [vmem:[%s1804_s18 + $0x20] sm:$0xff]  ;;  %v394_v33 = vld [vmem:[%s1804_s18 + $0x28] sm:$0xff]  ;;  %v395_v34 = vld [vmem:[%s1804_s18 + $0x30] sm:$0xff] }
  0x82   : > { %1018 = vmatpush3.msra.mxu0 %v407_v6  ;;  %1059 = vmatprep.subr.mxu1 %v552_v14  ;;  %v396_v35 = vld [vmem:[%s1804_s18 + $0x38] sm:$0xff]  ;;  %v543_v37 = vld [vmem:[%s1825_s7 + $0x10] sm:$0xff]  ;;  %v542_v38 = vld [vmem:[%s1825_s7 + $0x8] sm:$0xff]  ;;  %s2110_s18 = sld [smem:[#allocation32_spill]] (!%p943_p1) }
  0x83   : > { %1019 = vmatprep.subr.mxu0 %v406_v9  ;;  %1060 = vmatpush3.msra.mxu1 %v552_v14  ;;  %v544_v36 = vld [vmem:[%s1825_s7 + $0x18] sm:$0xff]  ;;  %v541_v39 = vld [vmem:[%s1825_s7] sm:$0xff] }
  0x84   : > { %1020 = vmatpush3.msra.mxu0 %v406_v9  ;;  %1061 = vmatprep.subr.mxu1 %v551_v16  ;;  %v942_v40 = vld [vmem:[%s385_s2] ss:$0 sm:$0xff] }
  0x85   : > { %1021 = vmatprep.subr.mxu0 %v405_v11  ;;  %1062 = vmatpush3.msra.mxu1 %v551_v16 }
  0x86   : > { %1022 = vmatpush3.msra.mxu0 %v405_v11  ;;  %1063 = vmatprep.subr.mxu1 %v550_v18 }
  0x87   : > { %1023 = vmatprep.subr.mxu0 %v404_v13  ;;  %1064 = vmatpush3.msra.mxu1 %v550_v18 }
  0x88   : > { %1024 = vmatpush3.msra.mxu0 %v404_v13  ;;  %1065 = vmatprep.subr.mxu1 %v549_v20 }
  0x89   : > { %1025 = vmatprep.subr.mxu0 %v403_v15  ;;  %1066 = vmatpush3.msra.mxu1 %v549_v20 }
  0x8a   : > { %1026 = vmatpush3.msra.mxu0 %v403_v15  ;;  %1067 = vmatprep.subr.mxu1 %v548_v22 }
  0x8b   : > { %1027 = vmatprep.subr.mxu0 %v402_v17  ;;  %1068 = vmatpush3.msra.mxu1 %v548_v22 }
  0x8c   : > { %1028 = vmatpush3.msra.mxu0 %v402_v17  ;;  %1069 = vmatprep.subr.mxu1 %v547_v24 }
  0x8d   : > { %1029 = vmatprep.subr.mxu0 %v401_v19  ;;  %1070 = vmatpush3.msra.mxu1 %v547_v24 }
  0x8e   : > { %1030 = vmatpush3.msra.mxu0 %v401_v19  ;;  %1071 = vmatprep.subr.mxu1 %v546_v26 }
  0x8f   : > { %1031 = vmatprep.subr.mxu0 %v400_v21  ;;  %1072 = vmatpush3.msra.mxu1 %v546_v26 }
  0x90   : > { %1032 = vmatpush3.msra.mxu0 %v400_v21  ;;  %1073 = vmatprep.subr.mxu1 %v545_v28 }
  0x91   : > { %1033 = vmatprep.subr.mxu0 %v399_v23  ;;  %1074 = vmatpush3.msra.mxu1 %v545_v28 }
  0x92   : > { %1034 = vmatpush3.msra.mxu0 %v399_v23  ;;  %1075 = vmatprep.subr.mxu1 %v544_v36 }
  0x93   : > { %1035 = vmatprep.subr.mxu0 %v398_v25  ;;  %1076 = vmatpush3.msra.mxu1 %v544_v36 }
  0x94   : > { %1036 = vmatpush3.msra.mxu0 %v398_v25  ;;  %1077 = vmatprep.subr.mxu1 %v543_v37 }
  0x95   : > { %1037 = vmatprep.subr.mxu0 %v397_v27  ;;  %1078 = vmatpush3.msra.mxu1 %v543_v37 }
  0x96   : > { %1038 = vmatpush3.msra.mxu0 %v397_v27  ;;  %1079 = vmatprep.subr.mxu1 %v542_v38 }
  0x97   : > { %1040 = vmatmul.mubr.f32.vlgmr.msra.gmra.mxu0 %v390_v29  ;;  %1080 = vmatpush3.msra.mxu1 %v542_v38 }
  0x98   : > { %1042 = vmatprep.mubr.f32.mxu0 %v391_v30  ;;  %1081 = vmatprep.subr.mxu1 %v541_v39 }
  0x99   : > { %1082 = vmatpush3.msra.mxu1 %v541_v39 }
  0x9b   : > { %1043 = vmatmul.mubr.f32.gmra.mxu0 %v392_v31 }
  0x9c   : > { %1045 = vmatprep.mubr.f32.mxu0 %v393_v32 }
  0x9f   : > { %1046 = vmatmul.mubr.f32.gmra.mxu0 %v394_v33 }
  0xa0   : > { %1048 = vmatprep.mubr.f32.mxu0 %v395_v34 }
  0xa3   : > { %1049 = vmatmul.mubr.f32.gmra.mxu0 %v396_v35 }
 0x157   : > { %v1041_v41 = vpop.f32.mrf.mxu0 }
 0x158   : > { %v492_v42 = vadd.f32 %v1041_v41, %v942_v40 }
 0x159   : > { %v486_v43 = vpop.f32.mrf.mxu0 }
 0x15a   : > { %v526_v44 = vmax.f32 %v492_v42, 0.0  ;;  %v487_v45 = vadd.f32 %v942_v40, %v486_v43 }
 0x15b   : > { %v1044_v46 = vpop.f32.mrf.mxu0 }
 0x15c   : > { %534 = vst [vmem:[%s1868_s20 + $0x8] sm:$0xff] %v526_v44  ;;  %v525_v47 = vmax.f32 %v487_v45, 0.0  ;;  %v502_v48 = vadd.f32 %v1044_v46, %v942_v40 }
 0x15d   : > { %v496_v49 = vpop.f32.mrf.mxu0 }
 0x15e   : > { %533 = vst [vmem:[%s1868_s20] sm:$0xff] %v525_v47  ;;  %v528_v50 = vmax.f32 %v502_v48, 0.0  ;;  %v497_v51 = vadd.f32 %v942_v40, %v496_v49  ;;  %1083 = vmatprep.mubr.f32.mxu1 %v525_v47 }
 0x15f   : > { %v1047_v52 = vpop.f32.mrf.mxu0  ;;  %1084 = vmatmul.mubr.f32.vlgmr.msra.gmra.mxu1 %v526_v44 }
 0x160   : > { %536 = vst [vmem:[%s1868_s20 + $0x18] sm:$0xff] %v528_v50  ;;  %v527_v53 = vmax.f32 %v497_v51, 0.0  ;;  %v512_v54 = vadd.f32 %v1047_v52, %v942_v40 }
 0x161   : > { %v506_v55 = vpop.f32.mrf.mxu0 }
 0x162   : > { %535 = vst [vmem:[%s1868_s20 + $0x10] sm:$0xff] %v527_v53  ;;  %v530_v56 = vmax.f32 %v512_v54, 0.0  ;;  %v507_v57 = vadd.f32 %v942_v40, %v506_v55  ;;  %1086 = vmatprep.mubr.f32.mxu1 %v527_v53 }
 0x163   : > { %v1050_v58 = vpop.f32.mrf.mxu0  ;;  %1087 = vmatmul.mubr.f32.gmra.mxu1 %v528_v50 }
 0x164   : > { %538 = vst [vmem:[%s1868_s20 + $0x28] sm:$0xff] %v530_v56  ;;  %v529_v59 = vmax.f32 %v507_v57, 0.0  ;;  %v522_v60 = vadd.f32 %v1050_v58, %v942_v40 }
 0x165   : > { %v516_v61 = vpop.f32.mrf.mxu0 }
 0x166   : > { %537 = vst [vmem:[%s1868_s20 + $0x20] sm:$0xff] %v529_v59  ;;  %v532_v62 = vmax.f32 %v522_v60, 0.0  ;;  %v517_v63 = vadd.f32 %v942_v40, %v516_v61  ;;  %1089 = vmatprep.mubr.f32.mxu1 %v529_v59 }
 0x167   : > { %1090 = vmatmul.mubr.f32.gmra.mxu1 %v530_v56 }
 0x168   : > { %540 = vst [vmem:[%s1868_s20 + $0x38] sm:$0xff] %v532_v62  ;;  %v531_v0 = vmax.f32 %v517_v63, 0.0 }
 0x16a   : > { %539 = vst [vmem:[%s1868_s20 + $0x30] sm:$0xff] %v531_v0  ;;  %1092 = vmatprep.mubr.f32.mxu1 %v531_v0 }
 0x16b   : > { %1093 = vmatmul.mubr.f32.gmra.mxu1 %v532_v62 }
 0x21f   : > { %v1085_v1 = vpop.f32.mrf.mxu1 }
 0x221   : > { %v623_v2 = vpop.f32.mrf.mxu1 }
 0x223   : > { %v1088_v3 = vpop.f32.mrf.mxu1 }
 0x225   : > { %v633_v4 = vpop.f32.mrf.mxu1 }
 0x227   : > { %v1091_v5 = vpop.f32.mrf.mxu1 }
 0x229   : > { %v643_v6 = vpop.f32.mrf.mxu1  ;;  %665 = sbr.rel (%p943_p1) target bundleno = 565 (0x235), region = 56 }
 0x22b   : > { %v1094_v7 = vpop.f32.mrf.mxu1 }
 0x22d   : > { %v653_v8 = vpop.f32.mrf.mxu1 }
 0x22e   : > { %v944_v9 = vld [vmem:[%s2110_s18] ss:$0 sm:$0xff] }
 0x22f   : > { %v673_v10 = vadd.f32 %v944_v9, %v623_v2  ;;  %v674_v11 = vadd.f32 %v1085_v1, %v944_v9  ;;  %v675_v12 = vadd.f32 %v944_v9, %v633_v4  ;;  %v676_v13 = vadd.f32 %v1088_v3, %v944_v9 }
 0x230   : > { %v677_v14 = vadd.f32 %v944_v9, %v643_v6  ;;  %v678_v15 = vadd.f32 %v1091_v5, %v944_v9  ;;  %v679_v16 = vadd.f32 %v944_v9, %v653_v8  ;;  %v680_v17 = vadd.f32 %v1094_v7, %v944_v9 }
 0x231   : > { %681 = vst [vmem:[%s1880_s26] sm:$0xff] %v673_v10  ;;  %682 = vst [vmem:[%s1880_s26 + $0x8] sm:$0xff] %v674_v11 }
 0x232   : > { %683 = vst [vmem:[%s1880_s26 + $0x10] sm:$0xff] %v675_v12  ;;  %684 = vst [vmem:[%s1880_s26 + $0x18] sm:$0xff] %v676_v13 }
 0x233   : > { %685 = vst [vmem:[%s1880_s26 + $0x20] sm:$0xff] %v677_v14  ;;  %686 = vst [vmem:[%s1880_s26 + $0x28] sm:$0xff] %v678_v15 }
 0x234   : > { %687 = vst [vmem:[%s1880_s26 + $0x30] sm:$0xff] %v679_v16  ;;  %688 = vst [vmem:[%s1880_s26 + $0x38] sm:$0xff] %v680_v17 }
 0x235 PF: > { %s2111_s16 = sld [smem:[#allocation18_spill]] }
 0x23b   : > { %p945_p4 = scmp.le.s32.totalorder %s2111_s16, 0 }
 0x23d   : > { %692 = sbr.rel (%p945_p4) target bundleno = 585 (0x249), region = 60 }
 0x242   : > { %v693_v18 = vld [vmem:[%s1880_s26] sm:$0xff]  ;;  %v694_v19 = vld [vmem:[%s1880_s26 + $0x8] sm:$0xff]  ;;  %v695_v20 = vld [vmem:[%s1880_s26 + $0x10] sm:$0xff] }
 0x243   : > { %v701_v21 = vadd.f32 %v693_v18, %v623_v2  ;;  %v702_v22 = vadd.f32 %v1085_v1, %v694_v19  ;;  %v703_v23 = vadd.f32 %v695_v20, %v633_v4  ;;  %v696_v24 = vld [vmem:[%s1880_s26 + $0x18] sm:$0xff]  ;;  %v697_v25 = vld [vmem:[%s1880_s26 + $0x20] sm:$0xff]  ;;  %v698_v26 = vld [vmem:[%s1880_s26 + $0x28] sm:$0xff] }
 0x244   : > { %v704_v27 = vadd.f32 %v1088_v3, %v696_v24  ;;  %v705_v28 = vadd.f32 %v697_v25, %v643_v6  ;;  %v706_v29 = vadd.f32 %v1091_v5, %v698_v26  ;;  %v699_v30 = vld [vmem:[%s1880_s26 + $0x30] sm:$0xff]  ;;  %v700_v31 = vld [vmem:[%s1880_s26 + $0x38] sm:$0xff] }
 0x245   : > { %709 = vst [vmem:[%s1880_s26] sm:$0xff] %v701_v21  ;;  %710 = vst [vmem:[%s1880_s26 + $0x8] sm:$0xff] %v702_v22  ;;  %v707_v32 = vadd.f32 %v699_v30, %v653_v8  ;;  %v708_v33 = vadd.f32 %v1094_v7, %v700_v31 }
 0x246   : > { %711 = vst [vmem:[%s1880_s26 + $0x10] sm:$0xff] %v703_v23  ;;  %712 = vst [vmem:[%s1880_s26 + $0x18] sm:$0xff] %v704_v27 }
 0x247   : > { %713 = vst [vmem:[%s1880_s26 + $0x20] sm:$0xff] %v705_v28  ;;  %714 = vst [vmem:[%s1880_s26 + $0x28] sm:$0xff] %v706_v29 }
 0x248   : > { %715 = vst [vmem:[%s1880_s26 + $0x30] sm:$0xff] %v707_v32  ;;  %716 = vst [vmem:[%s1880_s26 + $0x38] sm:$0xff] %v708_v33 }
 0x249 PF: > { %s2112_s0 = sld [smem:[#allocation19_spill]]  ;;  %s738_s11 = sshll.u32 %s1868_s20, 4  ;;  %s1914_s11 = int_to_ptr.vmem [resolvable:$true] %s738_s11 }
 0x24a   : > { %s2113_s5 = sld [smem:[#allocation18_spill]]  ;;  %s1923_s12 = scalar_lea.sflag [#allocation4], %s372_s30 }
 0x24b   : > { %s2114_s14 = sld [smem:[#allocation33_spill]]  ;;  %s1326_s2 = scalar_lea.vmem %s1914_s11, 1024 }
 0x24c   : > { %p1327_p7 = scmp.ne.s32.totalorder %s1914_s11, %s1326_s2  ;;  %s1512_s9 = smov [#allocation8]  }
 0x24d   : > { %s1330_s20 = sshll.u32 %s1512_s9, 4  ;;  %s1331_s20 = int_to_ptr.vmem [resolvable:$false] %s1330_s20 }
 0x24e   : > { %p1328_p9 = pnand %p1327_p7, %p1737_p3  ;;  %s1332_s23 = scalar_lea.vmem %s1331_s20, 2048 }
 0x24f   : > { %s957_s8 = sshll.u32 %s2112_s0, 5  ;;  %p1333_p11 = scmp.lt.s32.totalorder %s1914_s11, %s1331_s20 }
 0x250   : > { %s735_s13 = sadd.s32 %s2113_s5, %s957_s8  ;;  %p1329_p12 = pneg %p1328_p9 }
 0x251   : > { %s950_s7 = sshll.u32 %s735_s13, 7  ;;  %p1334_p0 = scmp.lt.s32.totalorder %s1332_s23, %s1326_s2 }
 0x252   : > { %s1919_s1 = scalar_lea.hbm %s2114_s14, %s950_s7 }
 0x253   : > { %p1335_p13 = por %p1334_p0, %p1333_p11 }
 0x255   : > { %p1336_p8 = pnand %p1335_p13, %p1329_p12 }
 0x257   : > { %1339 = shalt.err (!%p1336_p8)
}
 0x258   : > { %s1340_s30 = scalar_lea.hbm %s1919_s1, 1024  ;;  %s1344_s16 = scalar_lea.hbm %s2114_s14, 8192 }
 0x259   : > { %p1341_p2 = scmp.ne.s32.totalorder %s1919_s1, %s1340_s30  ;;  %p1345_p1 = scmp.lt.s32.totalorder %s1919_s1, %s2114_s14 }
 0x25a   : > { %p1346_p4 = scmp.lt.s32.totalorder %s1344_s16, %s1340_s30 }
 0x25b   : > { %p1342_p6 = pnand %p1341_p2, %p1737_p3 }
 0x25c   : > { %p1347_p7 = por %p1346_p4, %p1345_p1 }
 0x25d   : > { %p1343_p10 = pneg %p1342_p6 }
 0x25f   : > { %p1348_p9 = pnand %p1347_p7, %p1343_p10 }
 0x261   : > { %1351 = shalt.err (!%p1348_p9)
}
 0x262   : > { %s1513_s13 = smov 128   ;;  %s1514_s7 = smov 512  }
 0x263   : > { %s1515_s17 = smov 8   ;;  %s958_s19 = sshll.u32 %s2112_s0, 10 }
 0x264   : > { %1101 = dma.vmem_to_hbm [thread:$0]  (%p1737_p3), %s1914_s11, 1024, %s1919_s1, %s1923_s12, %s1513_s13, %s1514_s7, %s1515_s17  }
 0x265   : > { %s2115_s20 = sld [smem:[#allocation34_spill]]  ;;  %s754_s30 = sshll.u32 %s1880_s26, 4  ;;  %s1955_s30 = int_to_ptr.vmem [resolvable:$true] %s754_s30 }
 0x266   : > { %s723_s24 = scalar_lea.sflag [#allocation10], %s1798_s29  ;;  %s1352_s18 = scalar_lea.vmem %s1955_s30, 1024 }
 0x267   : > { %p1353_p12 = scmp.ne.s32.totalorder %s1955_s30, %s1352_s18  ;;  %s1516_s6 = smov [#allocation9]  }
 0x268   : > { %s1356_s11 = sshll.u32 %s1516_s6, 4  ;;  %s1357_s11 = int_to_ptr.vmem [resolvable:$false] %s1356_s11 }
 0x269   : > { %p1354_p11 = pnand %p1353_p12, %p1746_p5  ;;  %s1358_s0 = scalar_lea.vmem %s1357_s11, 2048 }
 0x26a   : > { %p1359_p3 = scmp.lt.s32.totalorder %s1955_s30, %s1357_s11  ;;  %p1360_p13 = scmp.lt.s32.totalorder %s1358_s0, %s1352_s18 }
 0x26b   : > { %s1952_s23 = scalar_lea.hbm %s2115_s20, %s958_s19  ;;  %p1355_p0 = pneg %p1354_p11 }
 0x26c   : > { %p1361_p8 = por %p1360_p13, %p1359_p3 }
 0x26e   : > { %p1362_p2 = pnand %p1361_p8, %p1355_p0 }
 0x270   : > { %1365 = shalt.err (!%p1362_p2)
}
 0x271   : > { %s1366_s26 = scalar_lea.hbm %s1952_s23, 1024  ;;  %s1370_s12 = scalar_lea.hbm %s2115_s20, 2048 }
 0x272   : > { %p1367_p6 = scmp.ne.s32.totalorder %s1952_s23, %s1366_s26  ;;  %p1371_p4 = scmp.lt.s32.totalorder %s1952_s23, %s2115_s20 }
 0x273   : > { %p1372_p7 = scmp.lt.s32.totalorder %s1370_s12, %s1366_s26 }
 0x274   : > { %p1368_p10 = pnand %p1367_p6, %p1746_p5 }
 0x275   : > { %p1373_p9 = por %p1372_p7, %p1371_p4 }
 0x276   : > { %p1369_p1 = pneg %p1368_p10 }
 0x278   : > { %p1374_p12 = pnand %p1373_p9, %p1369_p1 }
 0x27a   : > { %1377 = shalt.err (!%p1374_p12)
}
 0x27b   : > { %1102 = dma.vmem_to_hbm [thread:$0]  (%p1746_p5), %s1955_s30, 1024, %s1952_s23, %s723_s24, %s1513_s13, %s1513_s13, %s1515_s17  }
 0x27c PF: > { %p1123_p11 = scmp.ge.s32.totalorder %s1504_s10, 2  ;;  %s769_s8 = sand.u32 1, %s1452_s21  }
 0x27d   : > { %p2116_p0 = scmp.ne.s32.totalorder %s2096_s15, 0  ;;  %s770_s7 = scalar_lea.sflag [#allocation4], %s769_s8 }
 0x27f   : > { %p1116_p3 = pnand %p1123_p11, %p2116_p0 }
 0x281   : > { %p1117_p13 = pneg %p1116_p3 }
 0x283   : > { %1443 = dma.done.wait (%p1117_p13), %s770_s7, 1024  }
 0x284   : > { %1445 = vsyncadd (%p1117_p13), %s770_s7, 4294966272  ;;  %s2117_s4 = sld [smem:[#allocation28_spill]]  ;;  %s778_s19 = sand.u32 1, %s1476_s27  }
 0x285   : > { %s779_s2 = scalar_lea.sflag [#allocation10], %s778_s19 }
 0x28a   : > { %p2118_p8 = scmp.ne.s32.totalorder %s2117_s4, 0 }
 0x28c   : > { %p1119_p2 = pnand %p1123_p11, %p2118_p8 }
 0x28e   : > { %p1120_p6 = pneg %p1119_p2 }
 0x290   : > { %1447 = dma.done.wait (%p1120_p6), %s779_s2, 1024  }
 0x291   : > { %1449 = vsyncadd (%p1120_p6), %s779_s2, 4294966272  ;;  %s29_s10 = sadd.s32 1, %s1504_s10   ;;  %s2120_s15 = sld [smem:[#allocation15_spill]] }
 0x292   : > { %p1989_p5 = scmp.ge.s32.totalorder %s29_s10, 10   ;;  %s2121_s23 = sld [smem:[#allocation27_spill]] }
 0x293   : > { %s2122_s17 = sld [smem:[#allocation16_spill]]  ;;  %s2130_s21 = smov %s1456_s22 }
 0x294   : > { %s2123_s26 = sld [smem:[#allocation25_spill]]  ;;  %s2132_s24 = smov %s1468_s25 }
 0x295   : > { %s2124_s9 = sld [smem:[#allocation17_spill]]  ;;  %s2134_s27 = smov %s1480_s28 }
 0x296   : > { %s2125_s29 = sld [smem:[#allocation26_spill]] }
 0x297   : > { %s2126_s30 = sld [smem:[#allocation20_spill]]  ;;  %s2131_s22 = smov %s2120_s15 }
 0x298   : > { %s2127_s7 = sld [smem:[#allocation21_spill]] }
 0x299   : > { %s2128_s8 = sld [smem:[#allocation22_spill]]  ;;  %s2133_s25 = smov %s2122_s17 }
 0x29a   : > { %s2129_s18 = sld [smem:[#allocation23_spill]] }
 0x29b   : > { %s2135_s28 = smov %s2124_s9 }
 0x29c   :  { %28 = sbr.rel (!%p1989_p5) target bundleno = 21 (0x15), region = 137 }
 0x2a0   : > { %s2136_s9 = smov %s2129_s18 }
 0x2a1   :  { %784 = vsyncpa [#allocation3], 1 }
 0x2a2   :  { %786 = vsyncpa [#allocation3 + $0x1], 1 }
 0x2a3   :  { %787 = vsyncpa [#allocation6], 1 }
 0x2a4   :  { %789 = vsyncpa [#allocation6 + $0x1], 1 }
 0x2a5   :  { %790 = vsyncpa [#allocation4], 1 }
 0x2a6   :  { %792 = vsyncpa [#allocation4 + $0x1], 1 }
 0x2a7   :  { %793 = vsyncpa [#allocation10], 1 }
 0x2a8   :  { %795 = vsyncpa [#allocation10 + $0x1], 1 }

</bundles_post_ra>
